<compile_context>
chip_gen: v5e
topology: v5e:2x2
jax: 0.10.0
libtpu: 0.0.40
codegen_flags: <defaults>
</compile_context>

<pallas_src>
import math
from functools import partial

import jax
import jax.numpy as jnp
from jax import lax
from jax.experimental import pallas as pl
from jax.experimental.pallas import tpu as pltpu


def _round_up(x: int, m: int) -> int:
    return ((x + m - 1) // m) * m


_GATHER_VMEM_BUDGET = 20 * 1024 * 1024   # 2x rowbuf + 2x out tile, all generations
_MAX_TILE_N = 1024                       # per review: amortize ~0.35us/step overhead


def _embedding_gather_kernel(ids_ref, emb_hbm, out_ref, rowbuf, sem,
                             *, tile_n: int, n_half: int, scale: float,
                             unroll: int):
    """Double-buffered row gather from an HBM-resident embedding table.

    ids_ref : (N_pad,) int32 SMEM  -- scalar-prefetched flattened token ids
    emb_hbm : (V, D)  HBM ref      -- embedding table, never resident in VMEM
    out_ref : (tile_n, D) VMEM     -- output tile (lane-dense)
    rowbuf  : (2, tile_n, D) VMEM  -- double-buffered DMA landing buffer
    sem     : (2,) DMA semaphores  -- one per rowbuf slot
    """
    c = pl.program_id(0)          # "parallel" axis: split across TensorCores
    i = pl.program_id(1)          # "arbitrary" axis: sequential per core
    t = c * n_half + i            # global tile index
    slot = i % 2                  # slot holding *this* tile's rows

    def issue_tile(tile_idx, s):
        base = tile_idx * tile_n

        def body(r, carry):
            tok = ids_ref[base + r]
            pltpu.make_async_copy(emb_hbm.at[pl.ds(tok, 1)],
                                  rowbuf.at[s, pl.ds(r, 1)],
                                  sem.at[s]).start()
            return carry

        # Unrolled so several descriptor issues pack per bundle window.
        lax.fori_loop(0, tile_n, body, 0, unroll=unroll)

    # Prime the pipeline at the first inner step of this core's range.
    @pl.when(i == 0)
    def _prime():
        issue_tile(t, slot)

    # Prefetch the next tile's rows into the other slot while this tile's
    # copies are still in flight / being consumed.
    @pl.when(i + 1 < n_half)
    def _prefetch():
        issue_tile(t + 1, 1 - slot)

    # Aggregate wait: the DMA semaphore counts bytes, so a single wait whose
    # descriptor spans the whole (tile_n, D) slot drains exactly the tile_n
    # identical row copies issued into it.  Using rowbuf for both src and dst
    # keeps the descriptor in-bounds for any vocab size; only its byte count
    # (and the semaphore) matter for the wait.
    pltpu.make_async_copy(rowbuf.at[slot], rowbuf.at[slot], sem.at[slot]).wait()

    # Single VPU op: sqrt(D) scaling fused into the lane-dense writeback.
    out_ref[...] = (rowbuf[slot] * scale).astype(out_ref.dtype)


def embedding_layer(input_sequence: jax.Array, emb_table: jax.Array,
                    *, tile_n: int | None = None) -> jax.Array:
    """Pallas equivalent of EmbeddingLayer.forward.

    input_sequence: (batch, seq) int token ids
    emb_table:      (vocab_size, D) float table (padding row pre-zeroed)
    returns:        (batch, seq, D) embeddings * sqrt(D)
    """
    assert input_sequence.ndim == 2, "Expected rank-2 (batch, seq) input"
    B, S = input_sequence.shape
    V, D = emb_table.shape
    assert D % 2 == 0, "D must be even (module contract)"
    assert D % 128 == 0, "D must be a multiple of 128 for lane-dense tiles"
    # TODO(synk): pad D up to a multiple of 128 to support arbitrary widths.
    # TODO(synk): add a VMEM-resident fast path (in-VMEM dynamic row gather) for
    #             small tables instead of per-row HBM DMAs.
    # TODO(synk): for sub-32-bit tables (bf16/fp8), bitcast rows to uint32 pairs
    #             so per-row DMAs stay sublane-aligned.

    N = B * S
    itemsize = jnp.dtype(emb_table.dtype).itemsize
    scale = math.sqrt(D)

    # Clamp ids so an out-of-range token can never become an OOB HBM DMA
    # (nn.Embedding would raise instead; we clamp to stay in-kernel safe).
    ids_flat = jnp.clip(input_sequence.reshape(N).astype(jnp.int32), 0, V - 1)

    # Tile size: as large as the VMEM budget allows (2x rowbuf + 2x out tile),
    # capped at _MAX_TILE_N, and never more than ~half the token count so the
    # mandatory 2-way (megacore) grid split does not force excessive padding.
    cap = max(8, ((_GATHER_VMEM_BUDGET // (4 * D * itemsize)) // 8) * 8)
    tn = _MAX_TILE_N if tile_n is None else tile_n
    tn = max(8, _round_up(min(tn, cap), 8))
    tn = min(tn, max(8, _round_up((N + 1) // 2, 8)))

    # Pad N so the (2, n_half) grid divides evenly.  Pad tokens use id 0 (the
    # padding row) and are sliced off afterwards.
    n_pad = _round_up(N, 2 * tn)
    n_tiles = n_pad // tn
    n_half = n_tiles // 2
    if n_pad != N:
        ids_flat = jnp.pad(ids_flat, (0, n_pad - N))

    kernel = partial(_embedding_gather_kernel, tile_n=tn, n_half=n_half,
                     scale=scale, unroll=8)

    out_flat = pl.pallas_call(
        kernel,
        out_shape=jax.ShapeDtypeStruct((n_pad, D), emb_table.dtype),
        grid_spec=pltpu.PrefetchScalarGridSpec(
            num_scalar_prefetch=1,                        # ids -> SMEM
            grid=(2, n_half),                             # (cores, tiles-per-core)
            in_specs=[pl.BlockSpec(memory_space=pl.ANY)], # table stays in HBM
            out_specs=pl.BlockSpec((tn, D),
                                   lambda c, i, ids: (c * n_half + i, 0)),
            scratch_shapes=[
                pltpu.VMEM((2, tn, D), emb_table.dtype),  # double-buffered rows
                pltpu.SemaphoreType.DMA((2,)),            # one sem per slot
            ],
        ),
        compiler_params=pltpu.CompilerParams(
            dimension_semantics=("parallel", "arbitrary")),
    )(ids_flat, emb_table)

    return out_flat[:N].reshape(B, S, D)


def init_embedding_table(key, vocab_size: int, D: int, pad_idx: int = 0):
    """Deterministic init matching nn.Embedding: N(0,1) rows, padding row zeroed."""
    table = jax.random.normal(key, (vocab_size, D), dtype=jnp.float32)
    table = table.at[pad_idx].set(0.0)
    return table


if __name__ == "__main__":
    key = jax.random.PRNGKey(0)
    k1, k2, k3, k4 = jax.random.split(key, 4)

    # --- Config 1: small module-scale smoke test --------------------------
    vocab, D, batch, seq, pad_idx = 64, 128, 2, 8, 0
    table = init_embedding_table(k1, vocab, D, pad_idx)
    ids = jax.random.randint(k2, (batch, seq), minval=0, maxval=vocab,
                             dtype=jnp.int32)
    ids = ids.at[0, 0].set(pad_idx).at[1, -1].set(pad_idx)  # exercise pad row
    out = embedding_layer(ids, table)
    jax.block_until_ready(out)
    ref = table[ids] * math.sqrt(D)
    assert out.shape == (batch, seq, D)
    assert jnp.allclose(out, ref, atol=1e-5, rtol=1e-5)

    # --- Config 2: multiple tiles per core so the double-buffered prefetch
    #     and slot rotation are exercised end-to-end (grid (2, 4), 8 tiles). --
    vocab2, D2, batch2, seq2 = 512, 256, 2, 256
    table2 = init_embedding_table(k3, vocab2, D2, pad_idx)
    ids2 = jax.random.randint(k4, (batch2, seq2), minval=0, maxval=vocab2,
                              dtype=jnp.int32)
    out2 = embedding_layer(ids2, table2, tile_n=64)
    jax.block_until_ready(out2)
    ref2 = table2[ids2] * math.sqrt(D2)
    assert out2.shape == (batch2, seq2, D2)
    assert jnp.allclose(out2, ref2, atol=1e-5, rtol=1e-5)

    print("KERNEL_OK")
</pallas_src>

<mosaic_0001>
module attributes {stable_mosaic.version = 11 : i64} {
  func.func @_embedding_gather_kernel(%arg0: i32, %arg1: i32, %arg2: memref<16xi32, #tpu.memory_space<smem>>, %arg3: memref<64x128xf32, #tpu.memory_space<any>>, %arg4: memref<8x128xf32, #tpu.memory_space<vmem>>, %arg5: memref<2x8x128xf32, #tpu.memory_space<vmem>>, %arg6: memref<2x!tpu.dma_semaphore, #tpu.memory_space<semaphore_mem>>) attributes {dimension_semantics = [#tpu.dimension_semantics<parallel>, #tpu.dimension_semantics<arbitrary>], iteration_bounds = array<i64: 2, 1>, scalar_prefetch = 1 : i64, scratch_operands = 2 : i64, tpu.core_type = #tpu.core_type<tc>, window_params = [{}, {transform_indices = @transform_1, window_bounds = array<i64: 8, 128>}]} {
    %c1_i32 = arith.constant 1 : i32
    %0 = arith.muli %arg0, %c1_i32 : i32
    %1 = arith.addi %0, %arg1 : i32
    %c2_i32 = arith.constant 2 : i32
    %c0_i32 = arith.constant 0 : i32
    %2 = arith.cmpi eq, %c2_i32, %c0_i32 : i32
    %c1_i32_0 = arith.constant 1 : i32
    %3 = arith.select %2, %c1_i32_0, %c2_i32 : i32
    %4 = arith.remsi %arg1, %3 : i32
    %c0_i32_1 = arith.constant 0 : i32
    %5 = arith.cmpi ne, %4, %c0_i32_1 : i32
    %c0_i32_2 = arith.constant 0 : i32
    %6 = arith.cmpi slt, %4, %c0_i32_2 : i32
    %c0_i32_3 = arith.constant 0 : i32
    %7 = arith.cmpi slt, %3, %c0_i32_3 : i32
    %8 = arith.xori %6, %7 : i1
    %9 = arith.andi %8, %5 : i1
    %10 = arith.addi %4, %3 : i32
    %11 = arith.select %9, %10, %4 : i32
    %c0_i32_4 = arith.constant 0 : i32
    %12 = arith.cmpi eq, %arg1, %c0_i32_4 : i32
    %13 = arith.extui %12 : i1 to i32
    %c0_i32_5 = arith.constant 0 : i32
    %14 = arith.cmpi ne, %13, %c0_i32_5 : i32
    scf.if %14 {
      %c8_i32 = arith.constant 8 : i32
      %31 = arith.muli %1, %c8_i32 : i32
      %c0_i32_16 = arith.constant 0 : i32
      %32 = arith.addi %31, %c0_i32_16 : i32
      %33 = arith.index_cast %32 : i32 to index
      %34 = memref.load %arg2[%33] : memref<16xi32, #tpu.memory_space<smem>>
      %c0_i32_17 = arith.constant 0 : i32
      %35 = tpu.memref_slice %arg3[%34, %c0_i32_17] : memref<64x128xf32, #tpu.memory_space<any>> -> memref<1x128xf32, #tpu.memory_space<any>>
      %c0_i32_18 = arith.constant 0 : i32
      %36 = tpu.memref_slice %arg5[%11, %c0_i32_16, %c0_i32_18] : memref<2x8x128xf32, #tpu.memory_space<vmem>> -> memref<1x1x128xf32, #tpu.memory_space<vmem>>
      %37 = tpu.memref_squeeze %36 : memref<1x1x128xf32, #tpu.memory_space<vmem>> -> memref<1x128xf32, #tpu.memory_space<vmem>>
      %38 = tpu.memref_slice %arg6[%11] : memref<2x!tpu.dma_semaphore, #tpu.memory_space<semaphore_mem>> -> memref<1x!tpu.dma_semaphore, #tpu.memory_space<semaphore_mem>>
      %39 = tpu.memref_squeeze %38 : memref<1x!tpu.dma_semaphore, #tpu.memory_space<semaphore_mem>> -> memref<!tpu.dma_semaphore, #tpu.memory_space<semaphore_mem>>
      tpu.enqueue_dma source(%35 : memref<1x128xf32, #tpu.memory_space<any>>) target(%37 : memref<1x128xf32, #tpu.memory_space<vmem>>) target_semaphore(%39 : memref<!tpu.dma_semaphore, #tpu.memory_space<semaphore_mem>>)
      %c1_i32_19 = arith.constant 1 : i32
      %40 = arith.addi %31, %c1_i32_19 : i32
      %41 = arith.index_cast %40 : i32 to index
      %42 = memref.load %arg2[%41] : memref<16xi32, #tpu.memory_space<smem>>
      %c0_i32_20 = arith.constant 0 : i32
      %43 = tpu.memref_slice %arg3[%42, %c0_i32_20] : memref<64x128xf32, #tpu.memory_space<any>> -> memref<1x128xf32, #tpu.memory_space<any>>
      %c0_i32_21 = arith.constant 0 : i32
      %44 = tpu.memref_slice %arg5[%11, %c1_i32_19, %c0_i32_21] : memref<2x8x128xf32, #tpu.memory_space<vmem>> -> memref<1x1x128xf32, #tpu.memory_space<vmem>>
      %45 = tpu.memref_squeeze %44 : memref<1x1x128xf32, #tpu.memory_space<vmem>> -> memref<1x128xf32, #tpu.memory_space<vmem>>
      %46 = tpu.memref_slice %arg6[%11] : memref<2x!tpu.dma_semaphore, #tpu.memory_space<semaphore_mem>> -> memref<1x!tpu.dma_semaphore, #tpu.memory_space<semaphore_mem>>
      %47 = tpu.memref_squeeze %46 : memref<1x!tpu.dma_semaphore, #tpu.memory_space<semaphore_mem>> -> memref<!tpu.dma_semaphore, #tpu.memory_space<semaphore_mem>>
      tpu.enqueue_dma source(%43 : memref<1x128xf32, #tpu.memory_space<any>>) target(%45 : memref<1x128xf32, #tpu.memory_space<vmem>>) target_semaphore(%47 : memref<!tpu.dma_semaphore, #tpu.memory_space<semaphore_mem>>)
      %c2_i32_22 = arith.constant 2 : i32
      %48 = arith.addi %31, %c2_i32_22 : i32
      %49 = arith.index_cast %48 : i32 to index
      %50 = memref.load %arg2[%49] : memref<16xi32, #tpu.memory_space<smem>>
      %c0_i32_23 = arith.constant 0 : i32
      %51 = tpu.memref_slice %arg3[%50, %c0_i32_23] : memref<64x128xf32, #tpu.memory_space<any>> -> memref<1x128xf32, #tpu.memory_space<any>>
      %c0_i32_24 = arith.constant 0 : i32
      %52 = tpu.memref_slice %arg5[%11, %c2_i32_22, %c0_i32_24] : memref<2x8x128xf32, #tpu.memory_space<vmem>> -> memref<1x1x128xf32, #tpu.memory_space<vmem>>
      %53 = tpu.memref_squeeze %52 : memref<1x1x128xf32, #tpu.memory_space<vmem>> -> memref<1x128xf32, #tpu.memory_space<vmem>>
      %54 = tpu.memref_slice %arg6[%11] : memref<2x!tpu.dma_semaphore, #tpu.memory_space<semaphore_mem>> -> memref<1x!tpu.dma_semaphore, #tpu.memory_space<semaphore_mem>>
      %55 = tpu.memref_squeeze %54 : memref<1x!tpu.dma_semaphore, #tpu.memory_space<semaphore_mem>> -> memref<!tpu.dma_semaphore, #tpu.memory_space<semaphore_mem>>
      tpu.enqueue_dma source(%51 : memref<1x128xf32, #tpu.memory_space<any>>) target(%53 : memref<1x128xf32, #tpu.memory_space<vmem>>) target_semaphore(%55 : memref<!tpu.dma_semaphore, #tpu.memory_space<semaphore_mem>>)
      %c3_i32 = arith.constant 3 : i32
      %56 = arith.addi %31, %c3_i32 : i32
      %57 = arith.index_cast %56 : i32 to index
      %58 = memref.load %arg2[%57] : memref<16xi32, #tpu.memory_space<smem>>
      %c0_i32_25 = arith.constant 0 : i32
      %59 = tpu.memref_slice %arg3[%58, %c0_i32_25] : memref<64x128xf32, #tpu.memory_space<any>> -> memref<1x128xf32, #tpu.memory_space<any>>
      %c0_i32_26 = arith.constant 0 : i32
      %60 = tpu.memref_slice %arg5[%11, %c3_i32, %c0_i32_26] : memref<2x8x128xf32, #tpu.memory_space<vmem>> -> memref<1x1x128xf32, #tpu.memory_space<vmem>>
      %61 = tpu.memref_squeeze %60 : memref<1x1x128xf32, #tpu.memory_space<vmem>> -> memref<1x128xf32, #tpu.memory_space<vmem>>
      %62 = tpu.memref_slice %arg6[%11] : memref<2x!tpu.dma_semaphore, #tpu.memory_space<semaphore_mem>> -> memref<1x!tpu.dma_semaphore, #tpu.memory_space<semaphore_mem>>
      %63 = tpu.memref_squeeze %62 : memref<1x!tpu.dma_semaphore, #tpu.memory_space<semaphore_mem>> -> memref<!tpu.dma_semaphore, #tpu.memory_space<semaphore_mem>>
      tpu.enqueue_dma source(%59 : memref<1x128xf32, #tpu.memory_space<any>>) target(%61 : memref<1x128xf32, #tpu.memory_space<vmem>>) target_semaphore(%63 : memref<!tpu.dma_semaphore, #tpu.memory_space<semaphore_mem>>)
      %c4_i32 = arith.constant 4 : i32
      %64 = arith.addi %31, %c4_i32 : i32
      %65 = arith.index_cast %64 : i32 to index
      %66 = memref.load %arg2[%65] : memref<16xi32, #tpu.memory_space<smem>>
      %c0_i32_27 = arith.constant 0 : i32
      %67 = tpu.memref_slice %arg3[%66, %c0_i32_27] : memref<64x128xf32, #tpu.memory_space<any>> -> memref<1x128xf32, #tpu.memory_space<any>>
      %c0_i32_28 = arith.constant 0 : i32
      %68 = tpu.memref_slice %arg5[%11, %c4_i32, %c0_i32_28] : memref<2x8x128xf32, #tpu.memory_space<vmem>> -> memref<1x1x128xf32, #tpu.memory_space<vmem>>
      %69 = tpu.memref_squeeze %68 : memref<1x1x128xf32, #tpu.memory_space<vmem>> -> memref<1x128xf32, #tpu.memory_space<vmem>>
      %70 = tpu.memref_slice %arg6[%11] : memref<2x!tpu.dma_semaphore, #tpu.memory_space<semaphore_mem>> -> memref<1x!tpu.dma_semaphore, #tpu.memory_space<semaphore_mem>>
      %71 = tpu.memref_squeeze %70 : memref<1x!tpu.dma_semaphore, #tpu.memory_space<semaphore_mem>> -> memref<!tpu.dma_semaphore, #tpu.memory_space<semaphore_mem>>
      tpu.enqueue_dma source(%67 : memref<1x128xf32, #tpu.memory_space<any>>) target(%69 : memref<1x128xf32, #tpu.memory_space<vmem>>) target_semaphore(%71 : memref<!tpu.dma_semaphore, #tpu.memory_space<semaphore_mem>>)
      %c5_i32 = arith.constant 5 : i32
      %72 = arith.addi %31, %c5_i32 : i32
      %73 = arith.index_cast %72 : i32 to index
      %74 = memref.load %arg2[%73] : memref<16xi32, #tpu.memory_space<smem>>
      %c0_i32_29 = arith.constant 0 : i32
      %75 = tpu.memref_slice %arg3[%74, %c0_i32_29] : memref<64x128xf32, #tpu.memory_space<any>> -> memref<1x128xf32, #tpu.memory_space<any>>
      %c0_i32_30 = arith.constant 0 : i32
      %76 = tpu.memref_slice %arg5[%11, %c5_i32, %c0_i32_30] : memref<2x8x128xf32, #tpu.memory_space<vmem>> -> memref<1x1x128xf32, #tpu.memory_space<vmem>>
      %77 = tpu.memref_squeeze %76 : memref<1x1x128xf32, #tpu.memory_space<vmem>> -> memref<1x128xf32, #tpu.memory_space<vmem>>
      %78 = tpu.memref_slice %arg6[%11] : memref<2x!tpu.dma_semaphore, #tpu.memory_space<semaphore_mem>> -> memref<1x!tpu.dma_semaphore, #tpu.memory_space<semaphore_mem>>
      %79 = tpu.memref_squeeze %78 : memref<1x!tpu.dma_semaphore, #tpu.memory_space<semaphore_mem>> -> memref<!tpu.dma_semaphore, #tpu.memory_space<semaphore_mem>>
      tpu.enqueue_dma source(%75 : memref<1x128xf32, #tpu.memory_space<any>>) target(%77 : memref<1x128xf32, #tpu.memory_space<vmem>>) target_semaphore(%79 : memref<!tpu.dma_semaphore, #tpu.memory_space<semaphore_mem>>)
      %c6_i32 = arith.constant 6 : i32
      %80 = arith.addi %31, %c6_i32 : i32
      %81 = arith.index_cast %80 : i32 to index
      %82 = memref.load %arg2[%81] : memref<16xi32, #tpu.memory_space<smem>>
      %c0_i32_31 = arith.constant 0 : i32
      %83 = tpu.memref_slice %arg3[%82, %c0_i32_31] : memref<64x128xf32, #tpu.memory_space<any>> -> memref<1x128xf32, #tpu.memory_space<any>>
      %c0_i32_32 = arith.constant 0 : i32
      %84 = tpu.memref_slice %arg5[%11, %c6_i32, %c0_i32_32] : memref<2x8x128xf32, #tpu.memory_space<vmem>> -> memref<1x1x128xf32, #tpu.memory_space<vmem>>
      %85 = tpu.memref_squeeze %84 : memref<1x1x128xf32, #tpu.memory_space<vmem>> -> memref<1x128xf32, #tpu.memory_space<vmem>>
      %86 = tpu.memref_slice %arg6[%11] : memref<2x!tpu.dma_semaphore, #tpu.memory_space<semaphore_mem>> -> memref<1x!tpu.dma_semaphore, #tpu.memory_space<semaphore_mem>>
      %87 = tpu.memref_squeeze %86 : memref<1x!tpu.dma_semaphore, #tpu.memory_space<semaphore_mem>> -> memref<!tpu.dma_semaphore, #tpu.memory_space<semaphore_mem>>
      tpu.enqueue_dma source(%83 : memref<1x128xf32, #tpu.memory_space<any>>) target(%85 : memref<1x128xf32, #tpu.memory_space<vmem>>) target_semaphore(%87 : memref<!tpu.dma_semaphore, #tpu.memory_space<semaphore_mem>>)
      %c7_i32 = arith.constant 7 : i32
      %88 = arith.addi %31, %c7_i32 : i32
      %89 = arith.index_cast %88 : i32 to index
      %90 = memref.load %arg2[%89] : memref<16xi32, #tpu.memory_space<smem>>
      %c0_i32_33 = arith.constant 0 : i32
      %91 = tpu.memref_slice %arg3[%90, %c0_i32_33] : memref<64x128xf32, #tpu.memory_space<any>> -> memref<1x128xf32, #tpu.memory_space<any>>
      %c0_i32_34 = arith.constant 0 : i32
      %92 = tpu.memref_slice %arg5[%11, %c7_i32, %c0_i32_34] : memref<2x8x128xf32, #tpu.memory_space<vmem>> -> memref<1x1x128xf32, #tpu.memory_space<vmem>>
      %93 = tpu.memref_squeeze %92 : memref<1x1x128xf32, #tpu.memory_space<vmem>> -> memref<1x128xf32, #tpu.memory_space<vmem>>
      %94 = tpu.memref_slice %arg6[%11] : memref<2x!tpu.dma_semaphore, #tpu.memory_space<semaphore_mem>> -> memref<1x!tpu.dma_semaphore, #tpu.memory_space<semaphore_mem>>
      %95 = tpu.memref_squeeze %94 : memref<1x!tpu.dma_semaphore, #tpu.memory_space<semaphore_mem>> -> memref<!tpu.dma_semaphore, #tpu.memory_space<semaphore_mem>>
      tpu.enqueue_dma source(%91 : memref<1x128xf32, #tpu.memory_space<any>>) target(%93 : memref<1x128xf32, #tpu.memory_space<vmem>>) target_semaphore(%95 : memref<!tpu.dma_semaphore, #tpu.memory_space<semaphore_mem>>)
      %c8_i32_35 = arith.constant 8 : i32
    } else {
    }
    %c1_i32_6 = arith.constant 1 : i32
    %15 = arith.addi %arg1, %c1_i32_6 : i32
    %c1_i32_7 = arith.constant 1 : i32
    %16 = arith.cmpi slt, %15, %c1_i32_7 : i32
    %17 = arith.extui %16 : i1 to i32
    %c0_i32_8 = arith.constant 0 : i32
    %18 = arith.cmpi ne, %17, %c0_i32_8 : i32
    scf.if %18 {
      %c1_i32_16 = arith.constant 1 : i32
      %31 = arith.addi %1, %c1_i32_16 : i32
      %c1_i32_17 = arith.constant 1 : i32
      %32 = arith.subi %c1_i32_17, %11 : i32
      %c8_i32 = arith.constant 8 : i32
      %33 = arith.muli %31, %c8_i32 : i32
      %c0_i32_18 = arith.constant 0 : i32
      %34 = arith.addi %33, %c0_i32_18 : i32
      %35 = arith.index_cast %34 : i32 to index
      %36 = memref.load %arg2[%35] : memref<16xi32, #tpu.memory_space<smem>>
      %c0_i32_19 = arith.constant 0 : i32
      %37 = tpu.memref_slice %arg3[%36, %c0_i32_19] : memref<64x128xf32, #tpu.memory_space<any>> -> memref<1x128xf32, #tpu.memory_space<any>>
      %c0_i32_20 = arith.constant 0 : i32
      %38 = tpu.memref_slice %arg5[%32, %c0_i32_18, %c0_i32_20] : memref<2x8x128xf32, #tpu.memory_space<vmem>> -> memref<1x1x128xf32, #tpu.memory_space<vmem>>
      %39 = tpu.memref_squeeze %38 : memref<1x1x128xf32, #tpu.memory_space<vmem>> -> memref<1x128xf32, #tpu.memory_space<vmem>>
      %40 = tpu.memref_slice %arg6[%32] : memref<2x!tpu.dma_semaphore, #tpu.memory_space<semaphore_mem>> -> memref<1x!tpu.dma_semaphore, #tpu.memory_space<semaphore_mem>>
      %41 = tpu.memref_squeeze %40 : memref<1x!tpu.dma_semaphore, #tpu.memory_space<semaphore_mem>> -> memref<!tpu.dma_semaphore, #tpu.memory_space<semaphore_mem>>
      tpu.enqueue_dma source(%37 : memref<1x128xf32, #tpu.memory_space<any>>) target(%39 : memref<1x128xf32, #tpu.memory_space<vmem>>) target_semaphore(%41 : memref<!tpu.dma_semaphore, #tpu.memory_space<semaphore_mem>>)
      %c1_i32_21 = arith.constant 1 : i32
      %42 = arith.addi %33, %c1_i32_21 : i32
      %43 = arith.index_cast %42 : i32 to index
      %44 = memref.load %arg2[%43] : memref<16xi32, #tpu.memory_space<smem>>
      %c0_i32_22 = arith.constant 0 : i32
      %45 = tpu.memref_slice %arg3[%44, %c0_i32_22] : memref<64x128xf32, #tpu.memory_space<any>> -> memref<1x128xf32, #tpu.memory_space<any>>
      %c0_i32_23 = arith.constant 0 : i32
      %46 = tpu.memref_slice %arg5[%32, %c1_i32_21, %c0_i32_23] : memref<2x8x128xf32, #tpu.memory_space<vmem>> -> memref<1x1x128xf32, #tpu.memory_space<vmem>>
      %47 = tpu.memref_squeeze %46 : memref<1x1x128xf32, #tpu.memory_space<vmem>> -> memref<1x128xf32, #tpu.memory_space<vmem>>
      %48 = tpu.memref_slice %arg6[%32] : memref<2x!tpu.dma_semaphore, #tpu.memory_space<semaphore_mem>> -> memref<1x!tpu.dma_semaphore, #tpu.memory_space<semaphore_mem>>
      %49 = tpu.memref_squeeze %48 : memref<1x!tpu.dma_semaphore, #tpu.memory_space<semaphore_mem>> -> memref<!tpu.dma_semaphore, #tpu.memory_space<semaphore_mem>>
      tpu.enqueue_dma source(%45 : memref<1x128xf32, #tpu.memory_space<any>>) target(%47 : memref<1x128xf32, #tpu.memory_space<vmem>>) target_semaphore(%49 : memref<!tpu.dma_semaphore, #tpu.memory_space<semaphore_mem>>)
      %c2_i32_24 = arith.constant 2 : i32
      %50 = arith.addi %33, %c2_i32_24 : i32
      %51 = arith.index_cast %50 : i32 to index
      %52 = memref.load %arg2[%51] : memref<16xi32, #tpu.memory_space<smem>>
      %c0_i32_25 = arith.constant 0 : i32
      %53 = tpu.memref_slice %arg3[%52, %c0_i32_25] : memref<64x128xf32, #tpu.memory_space<any>> -> memref<1x128xf32, #tpu.memory_space<any>>
      %c0_i32_26 = arith.constant 0 : i32
      %54 = tpu.memref_slice %arg5[%32, %c2_i32_24, %c0_i32_26] : memref<2x8x128xf32, #tpu.memory_space<vmem>> -> memref<1x1x128xf32, #tpu.memory_space<vmem>>
      %55 = tpu.memref_squeeze %54 : memref<1x1x128xf32, #tpu.memory_space<vmem>> -> memref<1x128xf32, #tpu.memory_space<vmem>>
      %56 = tpu.memref_slice %arg6[%32] : memref<2x!tpu.dma_semaphore, #tpu.memory_space<semaphore_mem>> -> memref<1x!tpu.dma_semaphore, #tpu.memory_space<semaphore_mem>>
      %57 = tpu.memref_squeeze %56 : memref<1x!tpu.dma_semaphore, #tpu.memory_space<semaphore_mem>> -> memref<!tpu.dma_semaphore, #tpu.memory_space<semaphore_mem>>
      tpu.enqueue_dma source(%53 : memref<1x128xf32, #tpu.memory_space<any>>) target(%55 : memref<1x128xf32, #tpu.memory_space<vmem>>) target_semaphore(%57 : memref<!tpu.dma_semaphore, #tpu.memory_space<semaphore_mem>>)
      %c3_i32 = arith.constant 3 : i32
      %58 = arith.addi %33, %c3_i32 : i32
      %59 = arith.index_cast %58 : i32 to index
      %60 = memref.load %arg2[%59] : memref<16xi32, #tpu.memory_space<smem>>
      %c0_i32_27 = arith.constant 0 : i32
      %61 = tpu.memref_slice %arg3[%60, %c0_i32_27] : memref<64x128xf32, #tpu.memory_space<any>> -> memref<1x128xf32, #tpu.memory_space<any>>
      %c0_i32_28 = arith.constant 0 : i32
      %62 = tpu.memref_slice %arg5[%32, %c3_i32, %c0_i32_28] : memref<2x8x128xf32, #tpu.memory_space<vmem>> -> memref<1x1x128xf32, #tpu.memory_space<vmem>>
      %63 = tpu.memref_squeeze %62 : memref<1x1x128xf32, #tpu.memory_space<vmem>> -> memref<1x128xf32, #tpu.memory_space<vmem>>
      %64 = tpu.memref_slice %arg6[%32] : memref<2x!tpu.dma_semaphore, #tpu.memory_space<semaphore_mem>> -> memref<1x!tpu.dma_semaphore, #tpu.memory_space<semaphore_mem>>
      %65 = tpu.memref_squeeze %64 : memref<1x!tpu.dma_semaphore, #tpu.memory_space<semaphore_mem>> -> memref<!tpu.dma_semaphore, #tpu.memory_space<semaphore_mem>>
      tpu.enqueue_dma source(%61 : memref<1x128xf32, #tpu.memory_space<any>>) target(%63 : memref<1x128xf32, #tpu.memory_space<vmem>>) target_semaphore(%65 : memref<!tpu.dma_semaphore, #tpu.memory_space<semaphore_mem>>)
      %c4_i32 = arith.constant 4 : i32
      %66 = arith.addi %33, %c4_i32 : i32
      %67 = arith.index_cast %66 : i32 to index
      %68 = memref.load %arg2[%67] : memref<16xi32, #tpu.memory_space<smem>>
      %c0_i32_29 = arith.constant 0 : i32
      %69 = tpu.memref_slice %arg3[%68, %c0_i32_29] : memref<64x128xf32, #tpu.memory_space<any>> -> memref<1x128xf32, #tpu.memory_space<any>>
      %c0_i32_30 = arith.constant 0 : i32
      %70 = tpu.memref_slice %arg5[%32, %c4_i32, %c0_i32_30] : memref<2x8x128xf32, #tpu.memory_space<vmem>> -> memref<1x1x128xf32, #tpu.memory_space<vmem>>
      %71 = tpu.memref_squeeze %70 : memref<1x1x128xf32, #tpu.memory_space<vmem>> -> memref<1x128xf32, #tpu.memory_space<vmem>>
      %72 = tpu.memref_slice %arg6[%32] : memref<2x!tpu.dma_semaphore, #tpu.memory_space<semaphore_mem>> -> memref<1x!tpu.dma_semaphore, #tpu.memory_space<semaphore_mem>>
      %73 = tpu.memref_squeeze %72 : memref<1x!tpu.dma_semaphore, #tpu.memory_space<semaphore_mem>> -> memref<!tpu.dma_semaphore, #tpu.memory_space<semaphore_mem>>
      tpu.enqueue_dma source(%69 : memref<1x128xf32, #tpu.memory_space<any>>) target(%71 : memref<1x128xf32, #tpu.memory_space<vmem>>) target_semaphore(%73 : memref<!tpu.dma_semaphore, #tpu.memory_space<semaphore_mem>>)
      %c5_i32 = arith.constant 5 : i32
      %74 = arith.addi %33, %c5_i32 : i32
      %75 = arith.index_cast %74 : i32 to index
      %76 = memref.load %arg2[%75] : memref<16xi32, #tpu.memory_space<smem>>
      %c0_i32_31 = arith.constant 0 : i32
      %77 = tpu.memref_slice %arg3[%76, %c0_i32_31] : memref<64x128xf32, #tpu.memory_space<any>> -> memref<1x128xf32, #tpu.memory_space<any>>
      %c0_i32_32 = arith.constant 0 : i32
      %78 = tpu.memref_slice %arg5[%32, %c5_i32, %c0_i32_32] : memref<2x8x128xf32, #tpu.memory_space<vmem>> -> memref<1x1x128xf32, #tpu.memory_space<vmem>>
      %79 = tpu.memref_squeeze %78 : memref<1x1x128xf32, #tpu.memory_space<vmem>> -> memref<1x128xf32, #tpu.memory_space<vmem>>
      %80 = tpu.memref_slice %arg6[%32] : memref<2x!tpu.dma_semaphore, #tpu.memory_space<semaphore_mem>> -> memref<1x!tpu.dma_semaphore, #tpu.memory_space<semaphore_mem>>
      %81 = tpu.memref_squeeze %80 : memref<1x!tpu.dma_semaphore, #tpu.memory_space<semaphore_mem>> -> memref<!tpu.dma_semaphore, #tpu.memory_space<semaphore_mem>>
      tpu.enqueue_dma source(%77 : memref<1x128xf32, #tpu.memory_space<any>>) target(%79 : memref<1x128xf32, #tpu.memory_space<vmem>>) target_semaphore(%81 : memref<!tpu.dma_semaphore, #tpu.memory_space<semaphore_mem>>)
      %c6_i32 = arith.constant 6 : i32
      %82 = arith.addi %33, %c6_i32 : i32
      %83 = arith.index_cast %82 : i32 to index
      %84 = memref.load %arg2[%83] : memref<16xi32, #tpu.memory_space<smem>>
      %c0_i32_33 = arith.constant 0 : i32
      %85 = tpu.memref_slice %arg3[%84, %c0_i32_33] : memref<64x128xf32, #tpu.memory_space<any>> -> memref<1x128xf32, #tpu.memory_space<any>>
      %c0_i32_34 = arith.constant 0 : i32
      %86 = tpu.memref_slice %arg5[%32, %c6_i32, %c0_i32_34] : memref<2x8x128xf32, #tpu.memory_space<vmem>> -> memref<1x1x128xf32, #tpu.memory_space<vmem>>
      %87 = tpu.memref_squeeze %86 : memref<1x1x128xf32, #tpu.memory_space<vmem>> -> memref<1x128xf32, #tpu.memory_space<vmem>>
      %88 = tpu.memref_slice %arg6[%32] : memref<2x!tpu.dma_semaphore, #tpu.memory_space<semaphore_mem>> -> memref<1x!tpu.dma_semaphore, #tpu.memory_space<semaphore_mem>>
      %89 = tpu.memref_squeeze %88 : memref<1x!tpu.dma_semaphore, #tpu.memory_space<semaphore_mem>> -> memref<!tpu.dma_semaphore, #tpu.memory_space<semaphore_mem>>
      tpu.enqueue_dma source(%85 : memref<1x128xf32, #tpu.memory_space<any>>) target(%87 : memref<1x128xf32, #tpu.memory_space<vmem>>) target_semaphore(%89 : memref<!tpu.dma_semaphore, #tpu.memory_space<semaphore_mem>>)
      %c7_i32 = arith.constant 7 : i32
      %90 = arith.addi %33, %c7_i32 : i32
      %91 = arith.index_cast %90 : i32 to index
      %92 = memref.load %arg2[%91] : memref<16xi32, #tpu.memory_space<smem>>
      %c0_i32_35 = arith.constant 0 : i32
      %93 = tpu.memref_slice %arg3[%92, %c0_i32_35] : memref<64x128xf32, #tpu.memory_space<any>> -> memref<1x128xf32, #tpu.memory_space<any>>
      %c0_i32_36 = arith.constant 0 : i32
      %94 = tpu.memref_slice %arg5[%32, %c7_i32, %c0_i32_36] : memref<2x8x128xf32, #tpu.memory_space<vmem>> -> memref<1x1x128xf32, #tpu.memory_space<vmem>>
      %95 = tpu.memref_squeeze %94 : memref<1x1x128xf32, #tpu.memory_space<vmem>> -> memref<1x128xf32, #tpu.memory_space<vmem>>
      %96 = tpu.memref_slice %arg6[%32] : memref<2x!tpu.dma_semaphore, #tpu.memory_space<semaphore_mem>> -> memref<1x!tpu.dma_semaphore, #tpu.memory_space<semaphore_mem>>
      %97 = tpu.memref_squeeze %96 : memref<1x!tpu.dma_semaphore, #tpu.memory_space<semaphore_mem>> -> memref<!tpu.dma_semaphore, #tpu.memory_space<semaphore_mem>>
      tpu.enqueue_dma source(%93 : memref<1x128xf32, #tpu.memory_space<any>>) target(%95 : memref<1x128xf32, #tpu.memory_space<vmem>>) target_semaphore(%97 : memref<!tpu.dma_semaphore, #tpu.memory_space<semaphore_mem>>)
      %c8_i32_37 = arith.constant 8 : i32
    } else {
    }
    %c0_i32_9 = arith.constant 0 : i32
    %c0_i32_10 = arith.constant 0 : i32
    %19 = tpu.memref_slice %arg5[%11, %c0_i32_9, %c0_i32_10] : memref<2x8x128xf32, #tpu.memory_space<vmem>> -> memref<1x8x128xf32, #tpu.memory_space<vmem>>
    %20 = tpu.memref_squeeze %19 : memref<1x8x128xf32, #tpu.memory_space<vmem>> -> memref<8x128xf32, #tpu.memory_space<vmem>>
    %c0_i32_11 = arith.constant 0 : i32
    %c0_i32_12 = arith.constant 0 : i32
    %21 = tpu.memref_slice %arg5[%11, %c0_i32_11, %c0_i32_12] : memref<2x8x128xf32, #tpu.memory_space<vmem>> -> memref<1x8x128xf32, #tpu.memory_space<vmem>>
    %22 = tpu.memref_squeeze %21 : memref<1x8x128xf32, #tpu.memory_space<vmem>> -> memref<8x128xf32, #tpu.memory_space<vmem>>
    %23 = tpu.memref_slice %arg6[%11] : memref<2x!tpu.dma_semaphore, #tpu.memory_space<semaphore_mem>> -> memref<1x!tpu.dma_semaphore, #tpu.memory_space<semaphore_mem>>
    %24 = tpu.memref_squeeze %23 : memref<1x!tpu.dma_semaphore, #tpu.memory_space<semaphore_mem>> -> memref<!tpu.dma_semaphore, #tpu.memory_space<semaphore_mem>>
    tpu.wait_dma2 semaphore(%24 : memref<!tpu.dma_semaphore, #tpu.memory_space<semaphore_mem>>) src(%20 : memref<8x128xf32, #tpu.memory_space<vmem>>) dst(%22 : memref<8x128xf32, #tpu.memory_space<vmem>>)
    %25 = arith.index_cast %11 : i32 to index
    %c0 = arith.constant 0 : index
    %c0_13 = arith.constant 0 : index
    %26 = vector.load %arg5[%25, %c0, %c0_13] : memref<2x8x128xf32, #tpu.memory_space<vmem>>, vector<1x8x128xf32>
    %27 = vector.shape_cast %26 : vector<1x8x128xf32> to vector<8x128xf32>
    %cst = arith.constant 11.3137083 : f32
    %28 = vector.broadcast %cst : f32 to vector<8x128xf32>
    %29 = arith.mulf %27, %28 : vector<8x128xf32>
    %c0_14 = arith.constant 0 : index
    %c0_15 = arith.constant 0 : index
    %30 = vector.load %arg4[%c0_14, %c0_15] : memref<8x128xf32, #tpu.memory_space<vmem>>, vector<8x128xf32>
    tpu.vector_store %arg4[%c0_14, %c0_15], %29 {strides = array<i32>} : memref<8x128xf32, #tpu.memory_space<vmem>>, vector<8x128xf32>,
    return
  }
  func.func @transform_1(%arg0: i32, %arg1: i32, %arg2: memref<16xi32, #tpu.memory_space<smem>>) -> (i32, i32) {
    %c1_i32 = arith.constant 1 : i32
    %0 = arith.muli %arg0, %c1_i32 : i32
    %1 = arith.addi %0, %arg1 : i32
    %c0_i32 = arith.constant 0 : i32
    %c0_i32_0 = arith.constant 0 : i32
    return %1, %c0_i32 : i32, i32
  }
}

</mosaic_0001>

<bundles_post_ra>
// kernel: tpu_custom_call.1
= control target key start
LH: loop header
LB: loop body
LE: loop exit
PB: predicated region body
PF: predicated region fallthrough
CT: control target
= control target key end

     0   :  { %s870_s12 = smov [#allocation5]   ;;  %s1057_s0 = inlined_call_operand.hbm [shape: s32[16], index: 0, kind: input, shape index: {}]   ;;  %s1058_s1 = inlined_call_operand.hbm [shape: f32[64,128], index: 1, kind: input, shape index: {}]   ;;  %s1059_s2 = inlined_call_operand.hbm [shape: f32[16,128], index: 2, kind: output, shape index: {}]  }
   0x1   :  { %s8_s11 = sshll.u32 %s1057_s0, 4  ;;  %s9_s11 = int_to_ptr.hbm [resolvable:$true] %s8_s11 }
   0x2   :  { %11 = dma.hbm_to_smem %s9_s11, 16, %s870_s12, [#allocation4] }
   0x3   :  { %846 = dma.done.wait [#allocation4], 16 }
   0x4   :  { %847 = vsyncadd [#allocation4], 4294967280 }
   0x5   :  { %14 = sfence }
   0x6   :  { %15 = vsyncpa [#allocation7], 0 }
   0x7   :  { %17 = vsyncpa [#allocation7 + $0x1], 0  ;;  %s897_s13 = smov 0   ;;  %s899_s14 = smov 0  }
   0x8   :  { %s901_s15 = smov 0   ;;  %s903_s16 = smov 0  }
   0x9 LB: > { %s32_s0 = sadd.s32 1, %s864_s15  ;;  %s536_s17 = sadd.s32 4294967295, %s868_s16   ;;  %s868_s16 = sphi %s903_s16, %s23_s16   ;;  %s864_s15 = sphi %s901_s15, %s1064_s15   ;;  %s860_s14 = sphi %s899_s14, %s1063_s14   ;;  %s856_s13 = sphi %s897_s13, %s1062_s13  }
   0xa   : > { %p34_p0 = scmp.ge.s32.totalorder %s32_s0, 2  ;;  %p50_p1 = scmp.ne.s32.totalorder %s860_s14, %s856_s13 }
   0xb   : > { %s41_s18 = sadd.s32 1, %s860_s14  ;;  %p51_p2 = scmp.eq.s32.totalorder %s536_s17, 1 }
   0xc   : > { %s1066_s0 = smov (%p34_p0, %s32_s0), 0  ;;  %p45_p3 = scmp.eq.s32.totalorder %s868_s16, 1 }
   0xd   : > { %s38_s19 = ssub.s32 %s864_s15, %s1066_s0  ;;  %p923_p6 = por %p51_p2, %p50_p1 }
   0xe   : > { %p39_p4 = scmp.eq.s32.totalorder %s38_s19, 0  ;;  %p537_p5 = scmp.ne.s32.totalorder %s38_s19, 0 }
   0xf   : > { %p538_p8 = scmp.ge.s32.totalorder %s868_s16, 2 }
  0x10   : > { %s928_s21 = scalar_select %p39_p4, %s860_s14, %s41_s18  }
  0x11   : > { %p930_p7 = por %p537_p5, %p45_p3  ;;  %60 = sbr.rel (%p538_p8) target bundleno = 134 (0x86), region = 12 }
  0x12   : > { %s65_s23 = sand.u32 (!%p538_p8), 1, %s860_s14   ;;  %s936_s24 = sshll.u32 (!%p538_p8), %s864_s15, 3 }
  0x13   : > { %s940_s25 = sshll.u32 (!%p538_p8), %s65_s23, 3  ;;  %s87_s26 = sld [smem:[#allocation5 + %s936_s24]] (!%p538_p8) }
  0x14   : > { %s871_s27 = smov (!%p538_p8), [#allocation2]   ;;  %s105_s29 = sadd.s32 (!%p538_p8), 1, %s936_s24 }
  0x15   : > { %s101_s28 = sshll.u32 (!%p538_p8), %s871_s27, 4  ;;  %s106_s30 = sld [smem:[#allocation5 + %s105_s29]] (!%p538_p8)  ;;  %s102_s28 = int_to_ptr.vmem [resolvable:$true] %s101_s28 }
  0x16   : > { %s123_s3 = sadd.s32 2, %s936_s24  ;;  %s872_s4 = smov [#allocation2 + $0x1]  }
  0x17   : > { %s945_s5 = sshll.u32 %s872_s4, 4  ;;  %s124_s6 = sld [smem:[#allocation5 + %s123_s3]]  ;;  %s120_s5 = int_to_ptr.vmem [resolvable:$true] %s945_s5 }
  0x18   : > { %s873_s11 = smov [#allocation2 + $0x2]   ;;  %s956_s27 = scalar_lea.hbm %s1058_s1, 64 }
  0x19   : > { %s88_s9 = scalar_lea.hbm %s1058_s1, %s87_s26  ;;  %s951_s12 = sshll.u32 %s873_s11, 4  ;;  %s138_s12 = int_to_ptr.vmem [resolvable:$true] %s951_s12 }
  0x1a   : > { %s99_s10 = sshll.u32 %s88_s9, 4  ;;  %s100_s10 = int_to_ptr.hbm [resolvable:$true] %s99_s10 }
  0x1b   : > { %s610_s15 = sshra.s32 %s100_s10, 4  ;;  %s611_s15 = int_to_ptr.hbm [resolvable:$true] %s610_s15 }
  0x1c   : > { %s612_s17 = scalar_lea.hbm %s611_s15, 1  ;;  %p615_p10 = scmp.lt.s32.totalorder %s611_s15, %s1058_s1 }
  0x1d   : > { %p613_p9 = scmp.ne.s32.totalorder %s611_s15, %s612_s17  ;;  %p616_p11 = scmp.lt.s32.totalorder %s956_s27, %s612_s17 }
  0x1f   : > { %p617_p12 = por %p616_p11, %p615_p10 }
  0x21   : > { %p618_p13 = pnand %p617_p12, %p613_p9 }
  0x23   : > { %621 = shalt.err (!%p618_p13)  }
  0x24   : > { %104 = dma.hbm_to_vmem [thread:$0]  %s100_s10, 16, %s102_s28, [#allocation3] }
  0x25   : > { %s107_s7 = scalar_lea.hbm %s1058_s1, %s106_s30  ;;  %s125_s18 = scalar_lea.hbm %s1058_s1, %s124_s6 }
  0x26   : > { %s117_s8 = sshll.u32 %s107_s7, 4  ;;  %s135_s19 = sshll.u32 %s125_s18, 4  ;;  %s118_s8 = int_to_ptr.hbm [resolvable:$true] %s117_s8  ;;  %s136_s19 = int_to_ptr.hbm [resolvable:$true] %s135_s19 }
  0x27   : > { %s634_s15 = sshra.s32 %s118_s8, 4  ;;  %s635_s15 = int_to_ptr.hbm [resolvable:$true] %s634_s15 }
  0x28   : > { %s636_s17 = scalar_lea.hbm %s635_s15, 1  ;;  %p639_p1 = scmp.lt.s32.totalorder %s635_s15, %s1058_s1 }
  0x29   : > { %p637_p0 = scmp.ne.s32.totalorder %s635_s15, %s636_s17  ;;  %p640_p2 = scmp.lt.s32.totalorder %s956_s27, %s636_s17 }
  0x2b   : > { %p641_p3 = por %p640_p2, %p639_p1 }
  0x2d   : > { %p642_p4 = pnand %p641_p3, %p637_p0 }
  0x2f   : > { %645 = shalt.err (!%p642_p4)  }
  0x30   : > { %122 = dma.hbm_to_vmem [thread:$0]  %s118_s8, 16, %s120_s5, [#allocation3] }
  0x31   : > { %s141_s30 = sadd.s32 3, %s936_s24  ;;  %s658_s6 = sshra.s32 %s136_s19, 4  ;;  %s659_s6 = int_to_ptr.hbm [resolvable:$true] %s658_s6 }
  0x32   : > { %s660_s10 = scalar_lea.hbm %s659_s6, 1  ;;  %p663_p8 = scmp.lt.s32.totalorder %s659_s6, %s1058_s1 }
  0x33   : > { %p661_p5 = scmp.ne.s32.totalorder %s659_s6, %s660_s10  ;;  %p664_p9 = scmp.lt.s32.totalorder %s956_s27, %s660_s10 }
  0x35   : > { %p665_p10 = por %p664_p9, %p663_p8 }
  0x37   : > { %p666_p11 = pnand %p665_p10, %p661_p5 }
  0x39   : > { %669 = shalt.err (!%p666_p11)  }
  0x3a   : > { %140 = dma.hbm_to_vmem [thread:$0]  %s136_s19, 16, %s138_s12, [#allocation3] }
  0x3b   : > { %s142_s4 = sld [smem:[#allocation5 + %s141_s30]]  ;;  %s874_s7 = smov [#allocation2 + $0x3]  }
  0x3c   : > { %s155_s5 = sshll.u32 %s874_s7, 4  ;;  %s159_s8 = sadd.s32 4, %s936_s24  ;;  %s156_s5 = int_to_ptr.vmem [resolvable:$true] %s155_s5 }
  0x3d   : > { %s160_s9 = sld [smem:[#allocation5 + %s159_s8]]  ;;  %s177_s11 = sadd.s32 5, %s936_s24 }
  0x3e   : > { %s875_s18 = smov [#allocation2 + $0x4]   ;;  %s178_s17 = sld [smem:[#allocation5 + %s177_s11]] }
  0x3f   : > { %s982_s15 = sshll.u32 %s875_s18, 4  ;;  %s876_s19 = smov [#allocation2 + $0x5]   ;;  %s174_s15 = int_to_ptr.vmem [resolvable:$true] %s982_s15 }
  0x40   : > { %s988_s6 = sshll.u32 %s876_s19, 4  ;;  %s192_s6 = int_to_ptr.vmem [resolvable:$true] %s988_s6 }
  0x41   : > { %s143_s12 = scalar_lea.hbm %s1058_s1, %s142_s4 }
  0x42   : > { %s153_s30 = sshll.u32 %s143_s12, 4  ;;  %s154_s30 = int_to_ptr.hbm [resolvable:$true] %s153_s30 }
  0x43   : > { %s161_s26 = scalar_lea.hbm %s1058_s1, %s160_s9  ;;  %s682_s7 = sshra.s32 %s154_s30, 4  ;;  %s683_s7 = int_to_ptr.hbm [resolvable:$true] %s682_s7 }
  0x44   : > { %s684_s8 = scalar_lea.hbm %s683_s7, 1  ;;  %p687_p13 = scmp.lt.s32.totalorder %s683_s7, %s1058_s1 }
  0x45   : > { %p685_p12 = scmp.ne.s32.totalorder %s683_s7, %s684_s8  ;;  %p688_p0 = scmp.lt.s32.totalorder %s956_s27, %s684_s8 }
  0x47   : > { %p689_p1 = por %p688_p0, %p687_p13 }
  0x49   : > { %p690_p2 = pnand %p689_p1, %p685_p12 }
  0x4b   : > { %693 = shalt.err (!%p690_p2)  }
  0x4c   : > { %158 = dma.hbm_to_vmem [thread:$0]  %s154_s30, 16, %s156_s5, [#allocation3] }
  0x4d   : > { %s171_s4 = sshll.u32 %s161_s26, 4  ;;  %s179_s12 = scalar_lea.hbm %s1058_s1, %s178_s17  ;;  %s172_s4 = int_to_ptr.hbm [resolvable:$true] %s171_s4 }
  0x4e   : > { %s189_s9 = sshll.u32 %s179_s12, 4  ;;  %s706_s19 = sshra.s32 %s172_s4, 4  ;;  %s707_s19 = int_to_ptr.hbm [resolvable:$true] %s706_s19  ;;  %s190_s9 = int_to_ptr.hbm [resolvable:$true] %s189_s9 }
  0x4f   : > { %s708_s10 = scalar_lea.hbm %s707_s19, 1  ;;  %p711_p4 = scmp.lt.s32.totalorder %s707_s19, %s1058_s1 }
  0x50   : > { %p709_p3 = scmp.ne.s32.totalorder %s707_s19, %s708_s10  ;;  %p712_p5 = scmp.lt.s32.totalorder %s956_s27, %s708_s10 }
  0x52   : > { %p713_p8 = por %p712_p5, %p711_p4 }
  0x54   : > { %p714_p9 = pnand %p713_p8, %p709_p3 }
  0x56   : > { %717 = shalt.err (!%p714_p9)  }
  0x57   : > { %176 = dma.hbm_to_vmem [thread:$0]  %s172_s4, 16, %s174_s15, [#allocation3] }
  0x58   : > { %s195_s5 = sadd.s32 6, %s936_s24  ;;  %s730_s17 = sshra.s32 %s190_s9, 4  ;;  %s731_s17 = int_to_ptr.hbm [resolvable:$true] %s730_s17 }
  0x59   : > { %s732_s30 = scalar_lea.hbm %s731_s17, 1  ;;  %p735_p11 = scmp.lt.s32.totalorder %s731_s17, %s1058_s1 }
  0x5a   : > { %p733_p10 = scmp.ne.s32.totalorder %s731_s17, %s732_s30  ;;  %p736_p12 = scmp.lt.s32.totalorder %s956_s27, %s732_s30 }
  0x5c   : > { %p737_p13 = por %p736_p12, %p735_p11 }
  0x5e   : > { %p738_p0 = pnand %p737_p13, %p733_p10 }
  0x60   : > { %741 = shalt.err (!%p738_p0)  }
  0x61   : > { %194 = dma.hbm_to_vmem [thread:$0]  %s190_s9, 16, %s192_s6, [#allocation3] }
  0x62   : > { %s196_s8 = sld [smem:[#allocation5 + %s195_s5]]  ;;  %s213_s15 = sadd.s32 7, %s936_s24 }
  0x63   : > { %s214_s18 = sld [smem:[#allocation5 + %s213_s15]]  ;;  %s877_s4 = smov [#allocation2 + $0x6]  }
  0x64   : > { %s209_s29 = sshll.u32 %s877_s4, 4  ;;  %s878_s28 = smov [#allocation2 + $0x7]   ;;  %s210_s29 = int_to_ptr.vmem [resolvable:$true] %s209_s29 }
  0x65   : > { %s1015_s12 = sshll.u32 %s878_s28, 4  ;;  %s228_s12 = int_to_ptr.vmem [resolvable:$true] %s1015_s12 }
  0x68   : > { %s197_s3 = scalar_lea.hbm %s1058_s1, %s196_s8 }
  0x69   : > { %s207_s11 = sshll.u32 %s197_s3, 4  ;;  %s215_s9 = scalar_lea.hbm %s1058_s1, %s214_s18  ;;  %s208_s11 = int_to_ptr.hbm [resolvable:$true] %s207_s11 }
  0x6a   : > { %s754_s5 = sshra.s32 %s208_s11, 4  ;;  %s755_s5 = int_to_ptr.hbm [resolvable:$true] %s754_s5 }
  0x6b   : > { %s756_s30 = scalar_lea.hbm %s755_s5, 1  ;;  %p759_p2 = scmp.lt.s32.totalorder %s755_s5, %s1058_s1 }
  0x6c   : > { %p757_p1 = scmp.ne.s32.totalorder %s755_s5, %s756_s30  ;;  %p760_p3 = scmp.lt.s32.totalorder %s956_s27, %s756_s30 }
  0x6e   : > { %p761_p4 = por %p760_p3, %p759_p2 }
  0x70   : > { %p762_p5 = pnand %p761_p4, %p757_p1 }
  0x72   : > { %765 = shalt.err (!%p762_p5)  }
  0x73   : > { %212 = dma.hbm_to_vmem [thread:$0]  %s208_s11, 16, %s210_s29, [#allocation3] }
  0x74   : > { %s225_s8 = sshll.u32 %s215_s9, 4  ;;  %s226_s8 = int_to_ptr.hbm [resolvable:$true] %s225_s8 }
  0x75   : > { %s778_s15 = sshra.s32 %s226_s8, 4  ;;  %s779_s15 = int_to_ptr.hbm [resolvable:$true] %s778_s15 }
  0x76   : > { %s780_s4 = scalar_lea.hbm %s779_s15, 1  ;;  %p783_p9 = scmp.lt.s32.totalorder %s779_s15, %s1058_s1 }
  0x77   : > { %p781_p8 = scmp.ne.s32.totalorder %s779_s15, %s780_s4  ;;  %p784_p10 = scmp.lt.s32.totalorder %s956_s27, %s780_s4 }
  0x79   : > { %p785_p11 = por %p784_p10, %p783_p9 }
  0x7b   : > { %p786_p12 = pnand %p785_p11, %p781_p8 }
  0x7d   : > { %789 = shalt.err (!%p786_p12)  }
  0x7e   : > { %230 = dma.hbm_to_vmem [thread:$0]  %s226_s8, 16, %s228_s12, [#allocation3] }
  0x7f   : > { %s67_s19 = scalar_lea.vmem [#allocation6], %s940_s25 }
  0x80   : > { %848 = dma.done.wait [#allocation3], 128 }
  0x81   : > { %849 = vsyncadd [#allocation3], 4294967168  ;;  %s404_s3 = scalar_lea.hbm %s1059_s2, %s936_s24  ;;  %s406_s11 = sshll.u32 %s67_s19, 4  ;;  %v389_v0 = vld [vmem:[#allocation2] sm:$0xff]  ;;  %s407_s11 = int_to_ptr.vmem [resolvable:$true] %s406_s11 }
  0x82   : > { %s408_s17 = sshll.u32 %s404_s3, 4  ;;  %v390_v1 = vmul.f32 11.313708, %v389_v0  ;;  %s393_s27 = scalar_lea.sflag [#allocation7], %s65_s23  ;;  %s409_s17 = int_to_ptr.hbm [resolvable:$true] %s408_s17 }
  0x84   : > { %391 = vst [vmem:[%s67_s19] sm:$0xff] %v390_v1 }
  0x85   : > { %550 = dma.vmem_to_hbm [thread:$0]  (%p930_p7), %s407_s11, 128, %s409_s17, %s393_s27  }
  0x86 PF: > { %p556_p13 = scmp.ge.s32.totalorder %s868_s16, 1  ;;  %s420_s25 = sand.u32 1, %s856_s13  }
  0x87   : > { %s421_s24 = scalar_lea.sflag [#allocation7], %s420_s25 }
  0x88   : > { %p553_p0 = pnand %p556_p13, %p923_p6 }
  0x8a   : > { %p554_p1 = pneg %p553_p0 }
  0x8c   : > { %851 = dma.done.wait (%p554_p1), %s421_s24, 128  }
  0x8d   : > { %853 = vsyncadd (%p554_p1), %s421_s24, 4294967168  ;;  %s23_s16 = sadd.s32 1, %s868_s16   ;;  %s1062_s13 = smov %s860_s14 }
  0x8e   : > { %p20_p2 = scmp.ge.s32.totalorder %s23_s16, 3   ;;  %s1063_s14 = smov %s928_s21 }
  0x8f   : > { %s1064_s15 = smov %s1066_s0 }
  0x90   :  { %22 = sbr.rel (!%p20_p2) target bundleno = 9 (0x9), region = 153 }
  0x95   :  { %427 = vsyncpa [#allocation7], 1 }
  0x96   :  { %429 = vsyncpa [#allocation7 + $0x1], 1 }
  0x97   :  { %430 = vsyncmov [#allocation3] }
  0x9a   :  { %s431_s20 = vpop.sfrf %430 }
  0x9b   :  { %p546_p6 = scmp.ne.s32.totalorder %s431_s20, 0 }
  0x9d   :  { %435 = shalt.err (%p546_p6)  }
  0x9e   :  { %437 = vsyncmov [#allocation3 + $0x1] }
  0xa1   :  { %s438_s22 = vpop.sfrf %437 }
  0xa2   :  { %p547_p7 = scmp.ne.s32.totalorder %s438_s22, 0 }
  0xa4   :  { %442 = shalt.err (%p547_p7)  }

</bundles_post_ra>
